<compile_context>
chip_gen: v6e
topology: v6e:2x2x1
jax: 0.10.0
libtpu: 0.0.40
codegen_flags: <defaults>
</compile_context>

<pallas_src>
import functools

import jax
import jax.numpy as jnp
from jax.experimental import pallas as pl
from jax.experimental.pallas import tpu as pltpu


def _round_up(x, m):
    return (x + m - 1) // m * m


# ----------------------------------------------------------------------------
# Causal dilated conv as MXU dot(s)
# ----------------------------------------------------------------------------
def _conv_taps_dot(w_ref, window, *, ksize, dilation, out_cols, single_dot):
    """w_ref : (rows, ksize*Cin_p) k-major flattened weight (rows = Cout_p or 2*Cout_p)
       window: (Cin_p, >= out_cols + (ksize-1)*dilation)
       returns (rows, out_cols) float32."""
    cin_p = window.shape[0]
    if single_dot:
        # im2col: stack the K dilated taps along sublanes -> one MXU dot.
        xcat = jnp.concatenate(
            [window[:, k * dilation:k * dilation + out_cols] for k in range(ksize)],
            axis=0)
        return jnp.dot(w_ref[...], xcat, preferred_element_type=jnp.float32)
    # Large K*C: K accumulated dots on shifted views (no (K*C, L) copy; friendlier
    # to v5e's single vector-store slot; v7x's MRB accumulates in place).
    acc = jnp.dot(w_ref[:, :cin_p], window[:, :out_cols],
                  preferred_element_type=jnp.float32)
    for k in range(1, ksize):
        acc = acc + jnp.dot(
            w_ref[:, k * cin_p:(k + 1) * cin_p],
            window[:, k * dilation:k * dilation + out_cols],
            preferred_element_type=jnp.float32)
    return acc


# ----------------------------------------------------------------------------
# Fused TemporalBlock kernel (one grid point = one (batch, L-tile))
# ----------------------------------------------------------------------------
def _temporal_block_kernel(x_cur_ref, x_halo_ref, w1_ref, b1_ref, w2_ref, b2_ref,
                           *rest, ksize, dilation, tile, pad, halo, halo_p, cout_p,
                           has_downsample, single_dot):
    """x_cur_ref : (1, Cin_p, tile)    current L tile
       x_halo_ref: (1, Cin_p, halo_p)  128-aligned block ending at the tile start
       w1_ref    : (Cout_p or 2*Cout_p, K*Cin_p)  conv1 (+ fused 1x1 downsample rows)
       w2_ref    : (Cout_p, K*Cout_p)
       b*_ref    : (Cout_p, 1) float32
       o_ref     : (1, Cout_p, tile)
    """
    if has_downsample:
        bd_ref, o_ref = rest
    else:
        (o_ref,) = rest

    t = pl.program_id(1)
    ext = tile + pad                       # conv1 cols: this tile + conv2's left halo

    x_cur = x_cur_ref[0]                               # (Cin_p, tile)
    x_halo = x_halo_ref[0, :, halo_p - halo:]          # (Cin_p, halo) left context
    # Tile 0: the causal left context is Conv1d zero padding.
    x_halo = jnp.where(t > 0, x_halo, jnp.zeros_like(x_halo))
    x_win = jnp.concatenate([x_halo, x_cur], axis=1)   # (Cin_p, tile + halo)

    # ---- conv1 (+ fused downsample rows): MXU dot(s), f32 accum, bias, relu --
    h = _conv_taps_dot(w1_ref, x_win, ksize=ksize, dilation=dilation,
                       out_cols=ext, single_dot=single_dot)
    h1 = jnp.maximum(h[:cout_p] + b1_ref[...], 0.0)    # (Cout_p, ext)

    # conv2 must see zero padding at sequence positions < 0; only tile 0 has them,
    # so the mask is gated on the scalar program id (dead work skipped for t >= 1).
    def _mask_left(v):
        col = jax.lax.broadcasted_iota(jnp.int32, (1, ext), 1)
        return jnp.where(col >= pad, v, 0.0)
    h1 = jax.lax.cond(t == 0, _mask_left, lambda v: v, h1)

    # ---- conv2 on the in-register h1 (cast to the MXU storage dtype) --------
    h2 = _conv_taps_dot(w2_ref, h1.astype(x_cur.dtype), ksize=ksize,
                        dilation=dilation, out_cols=tile, single_dot=single_dot)
    h2 = jnp.maximum(h2 + b2_ref[...], 0.0)            # (Cout_p, tile)

    # ---- residual (fused 1x1 conv rows or identity), add, final relu --------
    if has_downsample:
        # Rows [Cout_p:) of the conv1 dot hold wd @ x (tap K-1) at cols pad:pad+tile.
        res = h[cout_p:, pad:pad + tile] + bd_ref[...]
    else:
        res = x_cur.astype(jnp.float32)
    o_ref[0] = jnp.maximum(h2 + res, 0.0).astype(o_ref.dtype)


# ----------------------------------------------------------------------------
# Per-block wrapper
# ----------------------------------------------------------------------------
def temporal_block(x, blk, *, dilation, ksize, tile, compute_dtype,
                   single_dot_max_k=256):
    """x: (B, Cin_p, L_pad) -> (B, Cout_p, L_pad). Channels / L already padded."""
    batch, cin_p, l_pad = x.shape
    cout_p = blk["b1"].shape[0]
    pad = (ksize - 1) * dilation
    halo = 2 * pad                         # conv1 halo + conv2 halo
    has_ds = blk["bd"] is not None
    if not has_ds:
        assert cin_p == cout_p, (cin_p, cout_p)
    n_tiles = l_pad // tile
    assert halo <= tile, (halo, tile)

    # Left-halo block: smallest multiple of 128 that covers halo AND divides tile,
    # so the halo window is expressible with a plain Blocked BlockSpec.
    halo_p = _round_up(halo, 128)
    while tile % halo_p:
        halo_p += 128
    tiles_per_halo = tile // halo_p
    single_dot = ksize * max(cin_p, cout_p) <= single_dot_max_k

    kernel = functools.partial(
        _temporal_block_kernel, ksize=ksize, dilation=dilation, tile=tile, pad=pad,
        halo=halo, halo_p=halo_p, cout_p=cout_p, has_downsample=has_ds,
        single_dot=single_dot)

    w1_rows = blk["w1"].shape[0]
    in_specs = [
        # Current L tile and a small left-halo window of the SAME input array:
        # VMEM stays O(Cin_p * tile) (no full-row residency, no HBM pad copy).
        pl.BlockSpec((1, cin_p, tile), lambda b, t: (b, 0, t)),
        pl.BlockSpec((1, cin_p, halo_p),
                     lambda b, t: (b, 0, jnp.maximum(t * tiles_per_halo - 1, 0))),
        pl.BlockSpec((w1_rows, ksize * cin_p), lambda b, t: (0, 0)),
        pl.BlockSpec((cout_p, 1), lambda b, t: (0, 0)),
        pl.BlockSpec((cout_p, ksize * cout_p), lambda b, t: (0, 0)),
        pl.BlockSpec((cout_p, 1), lambda b, t: (0, 0)),
    ]
    args = [x, x, blk["w1"], blk["b1"], blk["w2"], blk["b2"]]
    if has_ds:
        in_specs.append(pl.BlockSpec((cout_p, 1), lambda b, t: (0, 0)))
        args.append(blk["bd"])

    # Rough per-step VMEM budget: double-buffered blocks + weights + f32 temporaries.
    # Never below the 32 MiB scoped default; capped at 48 MiB so it fits v7x's
    # 64 MiB physical VMEM with headroom (v5e/v6e have 128 MiB).
    bpe = jnp.dtype(compute_dtype).itemsize
    est = 2 * bpe * (cin_p * (tile + halo_p) + cout_p * tile)
    est += 2 * bpe * (blk["w1"].size + blk["w2"].size)
    est += 4 * (ksize * cin_p + w1_rows + 3 * cout_p) * (tile + halo)
    vmem_limit = int(min(max(4 * est, 32 * 1024 * 1024), 48 * 1024 * 1024))

    return pl.pallas_call(
        kernel,
        out_shape=jax.ShapeDtypeStruct((batch, cout_p, l_pad), compute_dtype),
        grid=(batch, n_tiles),
        in_specs=in_specs,
        out_specs=pl.BlockSpec((1, cout_p, tile), lambda b, t: (b, 0, t)),
        compiler_params=pltpu.CompilerParams(
            dimension_semantics=("parallel", "parallel"),
            vmem_limit_bytes=vmem_limit),
    )(*args)


# ----------------------------------------------------------------------------
# Weight / bias preparation (layout plumbing, done once outside the kernel)
# ----------------------------------------------------------------------------
def _flatten_conv_weight(w, cout_p, cin_p, dtype):
    """(Cout, Cin, K) -> lane-dense (Cout_p, K*Cin_p), k-major column order."""
    cout, cin, k = w.shape
    wp = jnp.zeros((cout_p, k, cin_p), dtype)
    wp = wp.at[:cout, :, :cin].set(jnp.transpose(w, (0, 2, 1)).astype(dtype))
    return wp.reshape(cout_p, k * cin_p)


def _build_conv1_weight(w1, wd, cout_p, cin_p, ksize, dtype):
    """conv1 weight with the 1x1 downsample fused into extra output rows.

    Rows [0, Cout_p): flattened conv1.  Rows [Cout_p, 2*Cout_p): wd placed in the
    tap-(K-1) column block, so one MXU dot yields h1 (all ext columns) and the
    residual (columns pad:pad+tile)."""
    w1f = _flatten_conv_weight(w1, cout_p, cin_p, dtype)
    if wd is None:
        return w1f
    cout, cin, _ = wd.shape
    wdp = jnp.zeros((cout_p, ksize, cin_p), dtype)
    wdp = wdp.at[:cout, ksize - 1, :cin].set(wd[:, :, 0].astype(dtype))
    return jnp.concatenate([w1f, wdp.reshape(cout_p, ksize * cin_p)], axis=0)


def _pad_bias(b, cout_p):
    b = b.reshape(-1)
    return jnp.zeros((cout_p, 1), jnp.float32).at[:b.shape[0], 0].set(
        b.astype(jnp.float32))


# ----------------------------------------------------------------------------
# Full TCN wrapper
# ----------------------------------------------------------------------------
def temporal_conv_net(x, all_params, *, ksize, compute_dtype=jnp.bfloat16,
                      max_tile=1024, single_dot_max_k=256):
    """x: (B, Cin, L) -> (B, num_channels[-1], L); block i uses dilation 2**i."""
    assert ksize >= 2
    batch, cin, seq_len = x.shape
    n_blocks = len(all_params)

    # One lane-dense, 128-aligned L tile shared by every block (so activations are
    # never re-padded between layers); it must cover the largest causal halo.
    max_halo = max(2 * (ksize - 1) * (2 ** i) for i in range(n_blocks))
    tile = min(max_tile, _round_up(seq_len, 128))
    tile = _round_up(max(tile, max_halo), 128)
    l_pad = _round_up(seq_len, tile)

    crnd = 8 if jnp.dtype(compute_dtype).itemsize == 4 else 16
    cin_p = _round_up(cin, crnd)

    out = (jnp.zeros((batch, cin_p, l_pad), compute_dtype)
           .at[:, :cin, :seq_len].set(x.astype(compute_dtype)))
    cur_cin_p = cin_p
    cout = cin
    for i, p in enumerate(all_params):
        dilation = 2 ** i
        cout = p["w1"].shape[0]
        cout_p = _round_up(cout, crnd)
        blk = {
            "w1": _build_conv1_weight(p["w1"], p["wd"], cout_p, cur_cin_p, ksize,
                                      compute_dtype),
            "b1": _pad_bias(p["b1"], cout_p),
            "w2": _flatten_conv_weight(p["w2"], cout_p, cout_p, compute_dtype),
            "b2": _pad_bias(p["b2"], cout_p),
            "bd": _pad_bias(p["bd"], cout_p) if p["bd"] is not None else None,
        }
        out = temporal_block(out, blk, dilation=dilation, ksize=ksize, tile=tile,
                             compute_dtype=compute_dtype,
                             single_dot_max_k=single_dot_max_k)
        cur_cin_p = cout_p
    return out[:, :cout, :seq_len].astype(x.dtype)


# ----------------------------------------------------------------------------
# Deterministic parameter construction (weight_norm: w = g * v / ||v||)
# ----------------------------------------------------------------------------
def _weight_norm_conv_params(key, cout, cin, ksize):
    kv, kg, kb = jax.random.split(key, 3)
    v = jax.random.normal(kv, (cout, cin, ksize), jnp.float32) * 0.1
    g = jnp.abs(jax.random.normal(kg, (cout, 1, 1), jnp.float32)) + 0.5
    norm = jnp.sqrt(jnp.sum(v * v, axis=(1, 2), keepdims=True))
    w = g * v / norm
    b = (jax.random.normal(kb, (cout,), jnp.float32) * 0.05).reshape(cout, 1)
    return w, b


def make_tcn_params(key, num_inputs, num_channels, ksize):
    params = []
    for i, cout in enumerate(num_channels):
        cin = num_inputs if i == 0 else num_channels[i - 1]
        key, k1, k2, k3, k4 = jax.random.split(key, 5)
        w1, b1 = _weight_norm_conv_params(k1, cout, cin, ksize)
        w2, b2 = _weight_norm_conv_params(k2, cout, cout, ksize)
        if cin != cout:
            wd = jax.random.normal(k3, (cout, cin, 1), jnp.float32) * 0.01
            bd = (jax.random.normal(k4, (cout,), jnp.float32) * 0.05).reshape(cout, 1)
        else:
            wd, bd = None, None
        params.append({"w1": w1, "b1": b1, "w2": w2, "b2": b2, "wd": wd, "bd": bd})
    return params


# ----------------------------------------------------------------------------
# Pure-JAX reference (for correctness check)
# ----------------------------------------------------------------------------
def _ref_causal_conv(x, w, b, dilation):
    batch, cin, seq_len = x.shape
    cout, _, k = w.shape
    pad = (k - 1) * dilation
    xp = jnp.pad(x, ((0, 0), (0, 0), (pad, 0)))
    out = jnp.zeros((batch, cout, seq_len), jnp.float32)
    for kk in range(k):
        out = out + jnp.einsum(
            "oi,bil->bol", w[:, :, kk],
            xp[:, :, kk * dilation:kk * dilation + seq_len],
            precision=jax.lax.Precision.HIGHEST)
    return out + b.reshape(1, -1, 1)


def _ref_tcn(x, all_params, *, ksize):
    out = x
    for i, p in enumerate(all_params):
        d = 2 ** i
        h1 = jax.nn.relu(_ref_causal_conv(out, p["w1"], p["b1"], d))
        h2 = jax.nn.relu(_ref_causal_conv(h1, p["w2"], p["b2"], d))
        res = out if p["wd"] is None else _ref_causal_conv(out, p["wd"], p["bd"], 1)
        out = jax.nn.relu(h2 + res)
    return out


# ----------------------------------------------------------------------------
if __name__ == "__main__":
    key = jax.random.PRNGKey(0)
    kx, kp = jax.random.split(key)

    # --- single-tile sanity at the module's nominal small shapes -------------
    batch, num_inputs, seq_len = 2, 4, 16
    num_channels = [8, 16]          # two TemporalBlocks, dilations 1 and 2
    kernel_size = 2
    x = jax.random.normal(kx, (batch, num_inputs, seq_len), jnp.float32)
    params = make_tcn_params(kp, num_inputs, num_channels, kernel_size)
    ref = _ref_tcn(x, params, ksize=kernel_size)

    out_f32 = jax.block_until_ready(
        temporal_conv_net(x, params, ksize=kernel_size, compute_dtype=jnp.float32))
    assert out_f32.shape == (batch, num_channels[-1], seq_len), out_f32.shape
    assert bool(jnp.all(out_f32 >= 0.0))           # final relu
    assert bool(jnp.allclose(out_f32, ref, atol=3e-2, rtol=3e-2)), (
        float(jnp.max(jnp.abs(out_f32 - ref))))

    out_bf16 = jax.block_until_ready(
        temporal_conv_net(x, params, ksize=kernel_size, compute_dtype=jnp.bfloat16))
    assert bool(jnp.allclose(out_bf16, ref, atol=1.2e-1, rtol=1.2e-1)), (
        float(jnp.max(jnp.abs(out_bf16 - ref))))

    # --- multi-L-tile path: seq_len > tile, dilations 1/2/4, ksize=3,
    #     identity residual (12->12) and fused-downsample residual (6->12, 12->20)
    kx2, _ = jax.random.split(jax.random.PRNGKey(1))
    x2 = jax.random.normal(kx2, (1, 6, 300), jnp.float32)
    params2 = make_tcn_params(jax.random.PRNGKey(2), 6, [12, 12, 20], 3)
    ref2 = _ref_tcn(x2, params2, ksize=3)
    out2 = jax.block_until_ready(
        temporal_conv_net(x2, params2, ksize=3, compute_dtype=jnp.float32,
                          max_tile=128))
    assert bool(jnp.allclose(out2, ref2, atol=3e-2, rtol=3e-2)), (
        float(jnp.max(jnp.abs(out2 - ref2))))

    # --- per-tap accumulated-dot path (im2col single dot disabled) -----------
    out3 = jax.block_until_ready(
        temporal_conv_net(x2, params2, ksize=3, compute_dtype=jnp.float32,
                          max_tile=128, single_dot_max_k=0))
    assert bool(jnp.allclose(out3, ref2, atol=3e-2, rtol=3e-2)), (
        float(jnp.max(jnp.abs(out3 - ref2))))

    print("KERNEL_OK")
</pallas_src>

<mosaic_0001>
module attributes {stable_mosaic.version = 11 : i64} {
  func.func @_temporal_block_kernel(%arg0: i32, %arg1: i32, %arg2: memref<1x8x128xf32, #tpu.memory_space<vmem>>, %arg3: memref<1x8x128xf32, #tpu.memory_space<vmem>>, %arg4: memref<16x16xf32, #tpu.memory_space<vmem>>, %arg5: memref<8x1xf32, #tpu.memory_space<vmem>>, %arg6: memref<8x16xf32, #tpu.memory_space<vmem>>, %arg7: memref<8x1xf32, #tpu.memory_space<vmem>>, %arg8: memref<8x1xf32, #tpu.memory_space<vmem>>, %arg9: memref<1x8x128xf32, #tpu.memory_space<vmem>>) attributes {dimension_semantics = [#tpu.dimension_semantics<parallel>, #tpu.dimension_semantics<parallel>], iteration_bounds = array<i64: 2, 1>, scalar_prefetch = 0 : i64, scratch_operands = 0 : i64, tpu.core_type = #tpu.core_type<tc>, window_params = [{transform_indices = @transform_0, window_bounds = array<i64: 1, 8, 128>}, {transform_indices = @transform_1, window_bounds = array<i64: 1, 8, 128>}, {pipeline_mode = #tpu.pipeline_mode<synchronous>, transform_indices = @transform_2, window_bounds = array<i64: 16, 16>}, {pipeline_mode = #tpu.pipeline_mode<synchronous>, transform_indices = @transform_3, window_bounds = array<i64: 8, 1>}, {pipeline_mode = #tpu.pipeline_mode<synchronous>, transform_indices = @transform_4, window_bounds = array<i64: 8, 16>}, {pipeline_mode = #tpu.pipeline_mode<synchronous>, transform_indices = @transform_5, window_bounds = array<i64: 8, 1>}, {pipeline_mode = #tpu.pipeline_mode<synchronous>, transform_indices = @transform_6, window_bounds = array<i64: 8, 1>}, {transform_indices = @transform_7, window_bounds = array<i64: 1, 8, 128>}]} {
    %c0 = arith.constant 0 : index
    %c0_0 = arith.constant 0 : index
    %c0_1 = arith.constant 0 : index
    %0 = vector.load %arg2[%c0, %c0_0, %c0_1] : memref<1x8x128xf32, #tpu.memory_space<vmem>>, vector<1x8x128xf32>
    %1 = vector.shape_cast %0 : vector<1x8x128xf32> to vector<8x128xf32>
    %c0_2 = arith.constant 0 : index
    %c0_3 = arith.constant 0 : index
    %c126 = arith.constant 126 : index
    %2 = vector.load %arg3[%c0_2, %c0_3, %c126] : memref<1x8x128xf32, #tpu.memory_space<vmem>>, vector<1x8x2xf32>
    %3 = vector.shape_cast %2 : vector<1x8x2xf32> to vector<8x2xf32>
    %c0_i32 = arith.constant 0 : i32
    %4 = arith.cmpi sgt, %arg1, %c0_i32 : i32
    %cst = arith.constant 0.000000e+00 : f32
    %5 = vector.broadcast %cst : f32 to vector<8x2xf32>
    %6 = arith.select %4, %3, %5 : vector<8x2xf32>
    %7 = tpu.concatenate %6, %1 in 1 : vector<8x2xf32>, vector<8x128xf32> -> vector<8x130xf32>
    %8 = vector.extract_strided_slice %7 {offsets = [0, 0], sizes = [8, 129], strides = [1, 1]} : vector<8x130xf32> to vector<8x129xf32>
    %9 = vector.extract_strided_slice %7 {offsets = [0, 1], sizes = [8, 129], strides = [1, 1]} : vector<8x130xf32> to vector<8x129xf32>
    %10 = tpu.concatenate %8, %9 in 0 : vector<8x129xf32>, vector<8x129xf32> -> vector<16x129xf32>
    %c0_4 = arith.constant 0 : index
    %c0_5 = arith.constant 0 : index
    %11 = vector.load %arg4[%c0_4, %c0_5] : memref<16x16xf32, #tpu.memory_space<vmem>>, vector<16x16xf32>
    %cst_6 = arith.constant dense<0.000000e+00> : vector<16x129xf32>
    %12 = tpu.matmul %11, %10, %cst_6 {dimension_numbers = #tpu.dot_dimension_numbers<[1], [0], [0], [1], [0, 0, 1, 1], [], []>} : vector<16x16xf32>, vector<16x129xf32>, vector<16x129xf32> -> vector<16x129xf32>
    %13 = vector.extract_strided_slice %12 {offsets = [0, 0], sizes = [8, 129], strides = [1, 1]} : vector<16x129xf32> to vector<8x129xf32>
    %c0_7 = arith.constant 0 : index
    %c0_8 = arith.constant 0 : index
    %14 = vector.load %arg5[%c0_7, %c0_8] : memref<8x1xf32, #tpu.memory_space<vmem>>, vector<8x1xf32>
    %15 = vector.broadcast %14 : vector<8x1xf32> to vector<8x129xf32>
    %16 = arith.addf %13, %15 : vector<8x129xf32>
    %cst_9 = arith.constant 0.000000e+00 : f32
    %17 = vector.broadcast %cst_9 : f32 to vector<8x129xf32>
    %18 = arith.maximumf %16, %17 : vector<8x129xf32>
    %c0_i32_10 = arith.constant 0 : i32
    %19 = arith.cmpi eq, %arg1, %c0_i32_10 : i32
    %20 = arith.extui %19 : i1 to i32
    %c0_i32_11 = arith.constant 0 : i32
    %21 = arith.cmpi ne, %20, %c0_i32_11 : i32
    %22 = scf.if %21 -> (vector<8x129xf32>) {
      %43 = tpu.iota {dimensions = array<i32: 1>} : vector<1x129xi32>
      %c1_i32 = arith.constant 1 : i32
      %44 = vector.broadcast %c1_i32 : i32 to vector<1x129xi32>
      %45 = arith.cmpi sge, %43, %44 : vector<1x129xi32>
      %cst_24 = arith.constant 0.000000e+00 : f32
      %46 = vector.shape_cast %45 : vector<1x129xi1> to vector<1x129xi1>
      %47 = vector.broadcast %46 : vector<1x129xi1> to vector<8x129xi1>
      %48 = vector.broadcast %cst_24 : f32 to vector<8x129xf32>
      %49 = arith.select %47, %18, %48 : vector<8x129xi1>, vector<8x129xf32>
      scf.yield %49 : vector<8x129xf32>
    } else {
      scf.yield %18 : vector<8x129xf32>
    }
    %23 = vector.extract_strided_slice %22 {offsets = [0, 0], sizes = [8, 128], strides = [1, 1]} : vector<8x129xf32> to vector<8x128xf32>
    %24 = vector.extract_strided_slice %22 {offsets = [0, 1], sizes = [8, 128], strides = [1, 1]} : vector<8x129xf32> to vector<8x128xf32>
    %25 = tpu.concatenate %23, %24 in 0 : vector<8x128xf32>, vector<8x128xf32> -> vector<16x128xf32>
    %c0_12 = arith.constant 0 : index
    %c0_13 = arith.constant 0 : index
    %26 = vector.load %arg6[%c0_12, %c0_13] : memref<8x16xf32, #tpu.memory_space<vmem>>, vector<8x16xf32>
    %cst_14 = arith.constant dense<0.000000e+00> : vector<8x128xf32>
    %27 = tpu.matmul %26, %25, %cst_14 {dimension_numbers = #tpu.dot_dimension_numbers<[1], [0], [0], [1], [0, 0, 1, 1], [], []>} : vector<8x16xf32>, vector<16x128xf32>, vector<8x128xf32> -> vector<8x128xf32>
    %c0_15 = arith.constant 0 : index
    %c0_16 = arith.constant 0 : index
    %28 = vector.load %arg7[%c0_15, %c0_16] : memref<8x1xf32, #tpu.memory_space<vmem>>, vector<8x1xf32>
    %29 = vector.broadcast %28 : vector<8x1xf32> to vector<8x128xf32>
    %30 = arith.addf %27, %29 : vector<8x128xf32>
    %cst_17 = arith.constant 0.000000e+00 : f32
    %31 = vector.broadcast %cst_17 : f32 to vector<8x128xf32>
    %32 = arith.maximumf %30, %31 : vector<8x128xf32>
    %33 = vector.extract_strided_slice %12 {offsets = [8, 1], sizes = [8, 128], strides = [1, 1]} : vector<16x129xf32> to vector<8x128xf32>
    %c0_18 = arith.constant 0 : index
    %c0_19 = arith.constant 0 : index
    %34 = vector.load %arg8[%c0_18, %c0_19] : memref<8x1xf32, #tpu.memory_space<vmem>>, vector<8x1xf32>
    %35 = vector.broadcast %34 : vector<8x1xf32> to vector<8x128xf32>
    %36 = arith.addf %33, %35 : vector<8x128xf32>
    %37 = arith.addf %32, %36 : vector<8x128xf32>
    %cst_20 = arith.constant 0.000000e+00 : f32
    %38 = vector.broadcast %cst_20 : f32 to vector<8x128xf32>
    %39 = arith.maximumf %37, %38 : vector<8x128xf32>
    %c0_21 = arith.constant 0 : index
    %c0_22 = arith.constant 0 : index
    %c0_23 = arith.constant 0 : index
    %40 = vector.load %arg9[%c0_21, %c0_22, %c0_23] : memref<1x8x128xf32, #tpu.memory_space<vmem>>, vector<1x8x128xf32>
    %41 = vector.shape_cast %40 : vector<1x8x128xf32> to vector<8x128xf32>
    %42 = vector.shape_cast %39 : vector<8x128xf32> to vector<1x8x128xf32>
    tpu.vector_store %arg9[%c0_21, %c0_22, %c0_23], %42 {strides = array<i32>} : memref<1x8x128xf32, #tpu.memory_space<vmem>>, vector<1x8x128xf32>,
    return
  }
  func.func @transform_0(%arg0: i32, %arg1: i32) -> (i32, i32, i32) {
    %c0_i32 = arith.constant 0 : i32
    %c0_i32_0 = arith.constant 0 : i32
    return %arg0, %c0_i32, %arg1 : i32, i32, i32
  }
  func.func @transform_1(%arg0: i32, %arg1: i32) -> (i32, i32, i32) {
    %c1_i32 = arith.constant 1 : i32
    %0 = arith.muli %arg1, %c1_i32 : i32
    %c1_i32_0 = arith.constant 1 : i32
    %1 = arith.subi %0, %c1_i32_0 : i32
    %c0_i32 = arith.constant 0 : i32
    %2 = arith.maxsi %1, %c0_i32 : i32
    %c0_i32_1 = arith.constant 0 : i32
    %c0_i32_2 = arith.constant 0 : i32
    return %arg0, %c0_i32_1, %2 : i32, i32, i32
  }
  func.func @transform_2(%arg0: i32, %arg1: i32) -> (i32, i32) {
    %c0_i32 = arith.constant 0 : i32
    %c0_i32_0 = arith.constant 0 : i32
    %c0_i32_1 = arith.constant 0 : i32
    return %c0_i32, %c0_i32_0 : i32, i32
  }
  func.func @transform_3(%arg0: i32, %arg1: i32) -> (i32, i32) {
    %c0_i32 = arith.constant 0 : i32
    %c0_i32_0 = arith.constant 0 : i32
    %c0_i32_1 = arith.constant 0 : i32
    return %c0_i32, %c0_i32_0 : i32, i32
  }
  func.func @transform_4(%arg0: i32, %arg1: i32) -> (i32, i32) {
    %c0_i32 = arith.constant 0 : i32
    %c0_i32_0 = arith.constant 0 : i32
    %c0_i32_1 = arith.constant 0 : i32
    return %c0_i32, %c0_i32_0 : i32, i32
  }
  func.func @transform_5(%arg0: i32, %arg1: i32) -> (i32, i32) {
    %c0_i32 = arith.constant 0 : i32
    %c0_i32_0 = arith.constant 0 : i32
    %c0_i32_1 = arith.constant 0 : i32
    return %c0_i32, %c0_i32_0 : i32, i32
  }
  func.func @transform_6(%arg0: i32, %arg1: i32) -> (i32, i32) {
    %c0_i32 = arith.constant 0 : i32
    %c0_i32_0 = arith.constant 0 : i32
    %c0_i32_1 = arith.constant 0 : i32
    return %c0_i32, %c0_i32_0 : i32, i32
  }
  func.func @transform_7(%arg0: i32, %arg1: i32) -> (i32, i32, i32) {
    %c0_i32 = arith.constant 0 : i32
    %c0_i32_0 = arith.constant 0 : i32
    return %arg0, %c0_i32, %arg1 : i32, i32, i32
  }
}

</mosaic_0001>

<bundles_post_ra>
// kernel: tpu_custom_call.1
= control target key start
LH: loop header
LB: loop body
LE: loop exit
PB: predicated region body
PF: predicated region fallthrough
CT: control target
= control target key end

     0   :  { %s1244_s0 = inlined_call_operand.vmem [shape: f32[2,8,128], index: 0, kind: input, shape index: {}]   ;;  %s1245_s1 = inlined_call_operand.hbm [shape: f32[2,8,128], index: 1, kind: input, shape index: {}]   ;;  %s1246_s2 = inlined_call_operand.hbm [shape: f32[16,16], index: 2, kind: input, shape index: {}]   ;;  %s1247_s3 = inlined_call_operand.vmem [shape: f32[8,1], index: 3, kind: input, shape index: {}]   ;;  %s1248_s4 = inlined_call_operand.vmem [shape: f32[8,16], index: 4, kind: input, shape index: {}]   ;;  %s1249_s5 = inlined_call_operand.vmem [shape: f32[8,1], index: 5, kind: input, shape index: {}]   ;;  %s1250_s6 = inlined_call_operand.vmem [shape: f32[8,1], index: 6, kind: input, shape index: {}]   ;;  %s1251_s7 = inlined_call_operand.hbm [shape: f32[2,8,128], index: 7, kind: output, shape index: {}]  }
   0x1   :  { %1256 = sst [smem:[#allocation14_spill]] %s1246_s2 }
   0x2   :  { %12 = vsyncpa [#allocation3], 0 }
   0x3   :  { %14 = vsyncpa [#allocation3 + $0x1], 0 }
   0x4   :  { %15 = vsyncpa [#allocation6], 0 }
   0x5   :  { %16 = vsyncpa [#allocation4], 0 }
   0x6   :  { %18 = vsyncpa [#allocation4 + $0x1], 0  ;;  %s1040_s24 = smov 0   ;;  %s1042_s25 = smov 0  }
   0x7   :  { %s1044_s26 = smov 0   ;;  %s1046_s27 = smov 0  }
   0x8   :  { %s1048_s28 = smov 0   ;;  %s1050_s29 = smov 0  }
   0x9 LB: > { %1257 = sst [smem:[#allocation11_spill]] %s984_s28  ;;  %s738_s30 = sadd.s32 4294967295, %s988_s29   ;;  %s988_s29 = sphi %s1050_s29, %s24_s29   ;;  %s984_s28 = sphi %s1048_s28, %s1275_s28   ;;  %s980_s27 = sphi %s1046_s27, %s1274_s27   ;;  %s976_s26 = sphi %s1044_s26, %s1278_s26   ;;  %s972_s25 = sphi %s1042_s25, %s1277_s25   ;;  %s968_s24 = sphi %s1040_s24, %s1276_s24  }
   0xa   : > { %s739_s8 = sadd.s32 4294967294, %s988_s29   ;;  %p92_p0 = scmp.ne.s32.totalorder %s972_s25, %s968_s24 }
   0xb   : > { %p1074_p1 = scmp.eq.s32.totalorder %s738_s30, 0  ;;  %p1078_p2 = scmp.eq.s32.totalorder %s738_s30, 1 }
   0xc   : > { %p229_p3 = scmp.eq.s32.totalorder %s739_s8, 1  ;;  %p740_p5 = scmp.ge.s32.totalorder %s988_s29, 1 }
   0xd   : > { %p1084_p4 = por %p1074_p1, %p92_p0  ;;  %p236_p7 = scmp.lt.s32.totalorder %s988_s29, 3 }
   0xe   : > { %p1089_p6 = por %p229_p3, %p92_p0  ;;  %s990_s14 = smov [#allocation5]  }
   0xf   : > { %s1260_s11 = scalar_select %p1084_p4, 1, 0 }
  0x10   : > { %s1261_s12 = scalar_select %p1089_p6, 1, 0 }
  0x11   : > { %p1094_p8 = pnand %p740_p5, %p236_p7  ;;  %s248_s15 = sshll.u32 %s990_s14, 4  ;;  %s249_s15 = int_to_ptr.vmem [resolvable:$true] %s248_s15 }
  0x12   : > { %1262 = sst [smem:[#allocation12_spill]] %s1261_s12  ;;  %s36_s17 = sadd.s32 1, %s984_s28 }
  0x13   : > { %p776_p9 = pneg %p1094_p8  ;;  %s861_s18 = scalar_lea.vmem %s249_s15, 256 }
  0x14   : > { %p862_p13 = scmp.ne.s32.totalorder %s249_s15, %s861_s18  ;;  %p869_p5 = scmp.lt.s32.totalorder %s249_s15, %s249_s15 }
  0x15   : > { %p1103_p11 = pnand %p776_p9, %p1074_p1  ;;  %p870_p7 = scmp.lt.s32.totalorder %s861_s18, %s861_s18 }
  0x17   : > { %p852_p12 = pneg %p1103_p11  ;;  %p871_p6 = por %p870_p7, %p869_p5 }
  0x19   : > { %p864_p0 = pnand %p862_p13, %p852_p12 }
  0x1b   : > { %p865_p3 = pneg %p864_p0 }
  0x1d   : > { %p872_p4 = pnand %p871_p6, %p865_p3 }
  0x1f   : > { %875 = shalt.err (!%p872_p4)
}
  0x20   : > { %s991_s19 = smov 128   ;;  %s992_s20 = smov 8  }
  0x21   : > { %s1265_s2 = sld [smem:[#allocation14_spill]]  ;;  %p38_p6 = scmp.ge.s32.totalorder %s36_s17, 2 }
  0x22   : > { %s79_s23 = sadd.s32 1, %s976_s26  ;;  %p86_p4 = scmp.ne.s32.totalorder %s976_s26, %s972_s25 }
  0x23   : > { %p87_p9 = scmp.eq.s32.totalorder %s988_s29, 0  ;;  %s1280_s17 = smov (%p38_p6, %s36_s17), 0 }
  0x24   : > { %1266 = sst [smem:[#allocation13_spill]] %s1280_s17  ;;  %p1127_p13 = por %p1078_p2, %p86_p4 }
  0x25   : > { %p1121_p12 = por %p87_p9, %p86_p4  ;;  %s74_s14 = ssub.s32 %s984_s28, %s1280_s17 }
  0x26   : > { %p789_p0 = scmp.lt.s32.totalorder %s988_s29, 2 }
  0x27   : > { %779 = dma.hbm_to_vmem [thread:$0]  (!%p1103_p11), %s1265_s2, 256, %s249_s15, [#allocation6], %s991_s19, %s991_s19, %s992_s20  }
  0x28   : > { %p77_p11 = scmp.eq.s32.totalorder %s74_s14, 0  ;;  %s284_s15 = sand.u32 1, %s976_s26  }
  0x29   : > { %s743_s16 = sshll.u32 %s284_s15, 3  ;;  %s744_s19 = sshll.u32 %s984_s28, 7 }
  0x2a   : > { %s1136_s18 = scalar_select %p77_p11, %s976_s26, %s79_s23  }
  0x2b   : > { %s297_s22 = scalar_lea.hbm %s1245_s1, %s744_s19  ;;  %s288_s2 = scalar_lea.vmem [#allocation2], %s743_s16 }
  0x2c   : > { %s299_s12 = sshll.u32 %s288_s2, 4  ;;  %p1144_p2 = pnand %p789_p0, %p1121_p12  ;;  %s300_s12 = int_to_ptr.vmem [resolvable:$true] %s299_s12 }
  0x2d   : > { %s285_s17 = scalar_lea.sflag [#allocation3], %s284_s15  ;;  %s889_s14 = scalar_lea.vmem %s300_s12, 128 }
  0x2e   : > { %p878_p3 = pneg %p1144_p2  ;;  %p890_p5 = scmp.ne.s32.totalorder %s300_s12, %s889_s14 }
  0x2f   : > { %s993_s23 = smov [#allocation2]  }
  0x30   : > { %p892_p7 = pnand %p890_p5, %p878_p3  ;;  %s894_s28 = sshll.u32 %s993_s23, 4  ;;  %s895_s28 = int_to_ptr.vmem [resolvable:$false] %s894_s28 }
  0x31   : > { %s896_s19 = scalar_lea.vmem %s895_s28, 256  ;;  %p897_p4 = scmp.lt.s32.totalorder %s300_s12, %s895_s28 }
  0x32   : > { %p893_p6 = pneg %p892_p7  ;;  %p898_p9 = scmp.lt.s32.totalorder %s896_s19, %s889_s14 }
  0x34   : > { %p899_p11 = por %p898_p9, %p897_p4 }
  0x36   : > { %p900_p10 = pnand %p899_p11, %p893_p6 }
  0x38   : > { %903 = shalt.err (!%p900_p10)
}
  0x39   : > { %783 = dma.hbm_to_vmem [thread:$0]  (!%p1144_p2), %s297_s22, 128, %s300_s12, %s285_s17  }
  0x3a   : > { %308 = sbr.rel (%p1094_p8) target bundleno = 847 (0x34f), region = 48  ;;  %s1155_s2 = sand.u32 (!%p1094_p8), 1, %s972_s25  }
  0x3b   : > { %s311_s30 = scalar_lea.sflag (!%p1094_p8), [#allocation3], %s1155_s2  ;;  %p1270_p12 = scmp.ne.s32.totalorder (!%p1094_p8), %s1260_s11, 0 }
  0x3f   : > { %955 = dma.done.wait (%p1270_p12), %s311_s30, 128  }
  0x40   : > { %957 = vsyncadd (%p1270_p12), %s311_s30, 4294967168 }
  0x41   : > { %959 = dma.done.wait (%p1074_p1), [#allocation6], 256  }
  0x42   : > { %961 = vsyncadd (%p1074_p1), [#allocation6], 4294967040  ;;  %p356_p8 = scmp.lt.s32.totalorder %s980_s27, 1  ;;  %v994_v0 = vmov 0.0   ;;  %s995_s28 = smov 2   ;;  %vm381_vm0 = vcmask 15360   ;;  %v492_v13 = vlaneseq }
  0x43   : > { %374 = vrot.lane.b32.xlu0 %v994_v0, %s995_s28  ;;  %465 = vmatprep.mubr.f32.mxu0 %v994_v0  ;;  %v478_v5 = vld [vmem:[%s1247_s3] sm:$0xff]  ;;  %s996_s20 = smov 127   ;;  %v997_v6 = vmov 0   ;;  %vm388_vm1 = vcmask 1039360   ;;  %v392_v11 = vld [vmem:[#allocation5] sm:$0xff]  ;;  %vm394_vm2 = vcmask 130048  }
  0x44   : > { %s357_s12 = scalar_select %p356_p8, %s980_s27, 1  ;;  %761 = vmatprep.subr.mxu1 %v994_v0  ;;  %848 = vset.pattern.permute.xlu0 %v997_v6  ;;  %v599_v7 = vld [vmem:[%s1250_s6] sm:$0xff]  ;;  %v393_v12 = vld [vmem:[#allocation5 + $0x8] sm:$0xff]  ;;  %v493_v15 = vand.u32 127, %v492_v13  ;;  %vm998_vm3 = vmmov 0  }
  0x45   : > { %849 = vset.pattern.permute.xlu1 %v997_v6  ;;  %765 = vmatprep.mubr.msk.f32.mxu1 %vm998_vm3, %v994_v0  ;;  %v519_v26 = vld [vmem:[%s1249_s5] sm:$0xff]  ;;  %s748_s30 = sshll.u32 %s1155_s2, 3  ;;  %s619_s9 = scalar_lea.sflag [#allocation4], %s1155_s2 }
  0x46   : > { %s749_s11 = sshll.u32 %s357_s12, 3  ;;  %vm495_vm4 = vcmp.ge.s32.totalorder %v493_v15, 1  ;;  %v518_v32 = vld [vmem:[%s1248_s4] sm:$0xff]  ;;  %s355_s12 = scalar_lea.vmem [#allocation7], %s748_s30 }
  0x47   : > { %s362_s15 = scalar_lea.vmem %s1244_s0, %s749_s11  ;;  %s633_s11 = sshll.u32 %s355_s12, 4  ;;  %s634_s11 = int_to_ptr.vmem [resolvable:$true] %s633_s11 }
  0x48   : > { %v366_v1 = vld [vmem:[%s362_s15] sm:$0xff]  ;;  %s904_s16 = scalar_lea.vmem %s634_s11, 128 }
  0x49   : > { %378 = vrot.lane.b32.xlu0 %v366_v1, %s995_s28  ;;  %s754_s28 = sshll.u32 %s980_s27, 7  ;;  %p905_p1 = scmp.ne.s32.totalorder %s634_s11, %s904_s16 }
  0x4a   : > { %s631_s15 = scalar_lea.hbm %s1251_s7, %s754_s28 }
  0x4b   : > { %p906_p10 = pnand %p905_p1, %p1127_p13 }
  0x4d   : > { %481 = vperm.xlu0 %848, %v478_v5   ;;  %p907_p0 = pneg %p906_p10 }
  0x51   : > { %602 = vperm.xlu0 %848, %v599_v7  }
  0xb5   : > { %v375_v2 = vpop.permute.xlu0 %374 }
  0xbb   : > { %v379_v3 = vpop.permute.xlu0 %378 }
  0xbc   : > { %v382_v4 = vsel %vm381_vm0, %v375_v2, %v379_v3 }
  0xbd   : > { %384 = vrot.lane.b32.xlu1 %v382_v4, %s996_s20 }
  0xc1   : > { %386 = vrot.lane.b32.xlu1 %v379_v3, %s996_s20 }
  0xc8   : > { %v482_v14 = vpop.permute.xlu0 %481 }
  0xcc   : > { %v603_v20 = vpop.permute.xlu0 %602 }
 0x12f   : > { %v385_v8 = vpop.permute.xlu1 %384 }
 0x133   : > { %v387_v9 = vpop.permute.xlu1 %386 }
 0x134   : > { %429 = vmatprep.subr.mxu0 %v387_v9  ;;  %v389_v10 = vsel %vm388_vm1, %v385_v8, %v387_v9 }
 0x135   : > { %430 = vmatpush1.msra.mxu0 %v389_v10 }
 0x136   : > { %431 = vmatprep.subr.mxu0 %v379_v3 }
 0x137   : > { %432 = vmatpush1.msra.mxu0 %v382_v4 }
 0x138   : > { %750 = vmatmul.mubr.msk.f32.vlgmr.msra.gmra.mxu0 %vm394_vm2, %v392_v11 }
 0x139   : > { %471 = vmatprep.mubr.f32.mxu0 %v994_v0 }
 0x13c   : > { %751 = vmatmul.mubr.msk.f32.gmra.mxu0 %vm394_vm2, %v393_v12 }
 0x1f8   : > { %v467_v16 = vpop.f32.mrf.mxu0 }
 0x1f9   : > { %v484_v17 = vadd.f32 %v482_v14, %v467_v16 }
 0x1fa   : > { %v469_v18 = vpop.f32.mrf.mxu0 }
 0x1fb   : > { %v486_v19 = vmax.f32 %v484_v17, 0.0  ;;  %v485_v21 = vadd.f32 %v482_v14, %v469_v18 }
 0x1fc   : > { %v473_v22 = vpop.f32.mrf.mxu0 }
 0x1fd   : > { %v605_v23 = vadd.f32 %v603_v20, %v473_v22  ;;  %v501_v24 = vsel %vm495_vm4, %v486_v19, 0.0  ;;  %v487_v25 = vmax.f32 %v485_v21, 0.0 }
 0x1fe   : > { %512 = vrot.lane.b32.xlu1 %v501_v24, %s996_s20  ;;  %v475_v27 = vpop.f32.mrf.mxu0 }
 0x1ff   : > { %609 = vrot.lane.b32.xlu0 %v605_v23, %s996_s20  ;;  %v606_v28 = vadd.f32 %v603_v20, %v475_v27 }
 0x202   : > { %514 = vrot.lane.b32.xlu1 %v487_v25, %s996_s20 }
 0x206   : > { %522 = vperm.xlu1 %849, %v519_v26  }
 0x20a   : > { %611 = vrot.lane.b32.xlu1 %v606_v28, %s996_s20  ;;  %s999_s20 = smov [#allocation7]  }
 0x20b   : > { %s908_s21 = sshll.u32 %s999_s20, 4  ;;  %s909_s21 = int_to_ptr.vmem [resolvable:$false] %s908_s21 }
 0x20c   : > { %s910_s27 = scalar_lea.vmem %s909_s21, 256  ;;  %p911_p2 = scmp.lt.s32.totalorder %s634_s11, %s909_s21 }
 0x20d   : > { %p912_p3 = scmp.lt.s32.totalorder %s910_s27, %s904_s16 }
 0x20f   : > { %p913_p5 = por %p912_p3, %p911_p2 }
 0x211   : > { %p914_p7 = pnand %p913_p5, %p907_p0 }
 0x270   : > { %v513_v29 = vpop.permute.xlu1 %512 }
 0x271   : > { %v610_v38 = vpop.permute.xlu0 %609 }
 0x274   : > { %v515_v30 = vpop.permute.xlu1 %514 }
 0x275   : > { %v516_v31 = vsel %vm388_vm1, %v513_v29, %v515_v30 }
 0x276   : > { %762 = vmatpush3.msra.mxu1 %v516_v31 }
 0x277   : > { %763 = vmatprep.subr.mxu1 %v994_v0 }
 0x278   : > { %764 = vmatpush3.msk.msra.mxu1 %vm495_vm4, %v486_v19 }
 0x279   : > { %766 = vmatmul.mubr.msk.f32.vlgmr.msra.gmra.mxu1 %vm394_vm2, %v518_v32 }
 0x281   : > { %v523_v33 = vpop.permute.xlu1 %522 }
 0x285   : > { %v612_v35 = vpop.permute.xlu1 %611 }
 0x286   : > { %v613_v40 = vsel %vm388_vm1, %v610_v38, %v612_v35 }
 0x339   : > { %v594_v34 = vpop.f32.mrf.mxu1 }
 0x33a   : > { %v595_v36 = vadd.f32 %v594_v34, %v523_v33 }
 0x33b   : > { %v767_v37 = vpop.f32.mrf.mxu1 }
 0x33c   : > { %v598_v39 = vmax.f32 %v595_v36, 0.0 }
 0x33e   : > { %v615_v41 = vadd.f32 %v613_v40, %v598_v39 }
 0x340   : > { %v616_v42 = vmax.f32 %v615_v41, 0.0 }
 0x342   : > { %617 = vst [vmem:[%s355_s12] sm:$0xff] %v616_v42 }
 0x343   : > { %917 = shalt.err (!%p914_p7)
}
 0x344   : > { %s918_s22 = scalar_lea.hbm %s631_s15, 128  ;;  %s922_s14 = scalar_lea.hbm %s1251_s7, 256 }
 0x345   : > { %p919_p6 = scmp.ne.s32.totalorder %s631_s15, %s918_s22  ;;  %p923_p11 = scmp.lt.s32.totalorder %s631_s15, %s1251_s7 }
 0x346   : > { %p924_p12 = scmp.lt.s32.totalorder %s922_s14, %s918_s22 }
 0x347   : > { %p920_p4 = pnand %p919_p6, %p1127_p13 }
 0x348   : > { %p925_p8 = por %p924_p12, %p923_p11 }
 0x349   : > { %p921_p9 = pneg %p920_p4 }
 0x34b   : > { %p926_p1 = pnand %p925_p8, %p921_p9 }
 0x34d   : > { %929 = shalt.err (!%p926_p1)
}
 0x34e   : > { %774 = dma.vmem_to_hbm [thread:$0]  (%p1127_p13), %s634_s11, 128, %s631_s15, %s619_s9  }
 0x34f PF: > { %s1271_s30 = sld [smem:[#allocation12_spill]]  ;;  %s645_s28 = sand.u32 1, %s968_s24  }
 0x350   : > { %p1273_p0 = scmp.ge.s32.totalorder %s988_s29, 2  ;;  %s646_s12 = scalar_lea.sflag [#allocation4], %s645_s28 }
 0x355   : > { %p1272_p10 = scmp.ne.s32.totalorder %s1271_s30, 0 }
 0x357   : > { %p785_p2 = pnand %p1273_p0, %p1272_p10 }
 0x359   : > { %p786_p3 = pneg %p785_p2 }
 0x35b   : > { %963 = dma.done.wait (%p786_p3), %s646_s12, 128  }
 0x35c   : > { %965 = vsyncadd (%p786_p3), %s646_s12, 4294967168  ;;  %s24_s29 = sadd.s32 1, %s988_s29   ;;  %s1274_s27 = sld [smem:[#allocation11_spill]] }
 0x35d   : > { %p21_p5 = scmp.ge.s32.totalorder %s24_s29, 4   ;;  %s1275_s28 = sld [smem:[#allocation13_spill]] }
 0x35e   : > { %s1276_s24 = smov %s972_s25  ;;  %s1277_s25 = smov %s976_s26 }
 0x35f   : > { %s1278_s26 = smov %s1136_s18  ;;  %23 = sbr.rel (!%p21_p5) target bundleno = 9 (0x9), region = 108 }
 0x364   :  { %651 = vsyncpa [#allocation3], 1 }
 0x365   :  { %653 = vsyncpa [#allocation3 + $0x1], 1 }
 0x366   :  { %654 = vsyncpa [#allocation6], 1 }
 0x367   :  { %655 = vsyncpa [#allocation4], 1 }
 0x368   :  { %657 = vsyncpa [#allocation4 + $0x1], 1 }

</bundles_post_ra>
